<compile_context>
chip_gen: v7x
topology: tpu7x:2x2x1
jax: 0.10.0
libtpu: 0.0.40
codegen_flags: <defaults>
</compile_context>

<pallas_src>
import functools

import jax
import jax.numpy as jnp
from jax.experimental import pallas as pl
from jax.experimental.pallas import tpu as pltpu

_F32_MIN = float(jnp.finfo(jnp.float32).min)


def _cbam_kernel(x_ref, w1t_ref, w2t_ref, wp_ref, o_ref, *, W, HW, CH):
    """x_ref/o_ref: (Nb,C,HW_pad); w1t: (C,Cr); w2t: (Cr,C); wp: (1, 18*HW_pad)."""
    Nb, C, HW_pad = x_ref.shape

    # ---- Pass 1: fused global sum+max pool over HW (one read of the tile) ----
    s_acc = jnp.zeros((Nb, C), jnp.float32)
    m_acc = jnp.full((Nb, C), _F32_MIN, jnp.float32)
    for start in range(0, HW_pad, CH):
        xc = x_ref[:, :, start:start + CH].astype(jnp.float32)     # (Nb, C, CH)
        s_acc = s_acc + jnp.sum(xc, axis=2)
        if start + CH > HW:      # chunk touches the lane padding: mask the max
            lane = start + jax.lax.broadcasted_iota(jnp.int32, (1, 1, CH), 2)
            xc_m = jnp.where(lane < HW, xc, _F32_MIN)
        else:
            xc_m = xc
        m_acc = jnp.maximum(m_acc, jnp.max(xc_m, axis=2))
    avg = s_acc * (1.0 / HW)                                        # true-HW mean

    # ---- Channel-attention MLP: two MXU matmuls on the stacked pools ---------
    pooled = jnp.concatenate([avg, m_acc], axis=0)                  # (2*Nb, C)
    h = jnp.maximum(
        jnp.dot(pooled, w1t_ref[...], preferred_element_type=jnp.float32), 0.0)
    fc = jnp.dot(h, w2t_ref[...], preferred_element_type=jnp.float32)
    ca = jax.nn.sigmoid(fc[:Nb] + fc[Nb:])                          # (Nb, C)

    # ---- Pass 2: channel scale fused into the spatial pools (one read) -------
    # avg_s = mean_c(ca_c * x_c), max_s = max_c(ca_c * x_c); x1 never stored.
    sum_chunks, max_chunks = [], []
    for start in range(0, HW_pad, CH):
        xc = x_ref[:, :, start:start + CH].astype(jnp.float32)
        x1c = xc * ca[:, :, None]
        sum_chunks.append(jnp.sum(x1c, axis=1) * (1.0 / C))
        max_chunks.append(jnp.max(x1c, axis=1))
    avg_s = jnp.concatenate(sum_chunks, axis=1)                     # (Nb, HW_pad)
    max_s = jnp.concatenate(max_chunks, axis=1)

    # ---- 3x3 spatial conv (padding=1, bias=False) -----------------------------
    # Per tap: one roll per map + one multiply by a pre-masked weight plane.
    acc = jnp.zeros((Nb, HW_pad), jnp.float32)
    for kh in range(3):
        for kw in range(3):
            d = (kh - 1) * W + (kw - 1)
            t = kh * 3 + kw
            wa = wp_ref[:, t * HW_pad:(t + 1) * HW_pad]             # (1, HW_pad)
            wm = wp_ref[:, (9 + t) * HW_pad:(10 + t) * HW_pad]
            if d == 0:
                acc = acc + avg_s * wa + max_s * wm
            else:
                sh = (-d) % HW_pad
                acc = acc + pltpu.roll(avg_s, sh, axis=1) * wa
                acc = acc + pltpu.roll(max_s, sh, axis=1) * wm
    sa = jax.nn.sigmoid(acc)                                        # (Nb, HW_pad)

    # ---- Pass 3: o = x * ca * sa (one read + one write) ----------------------
    cs = ca[:, :, None]
    for start in range(0, HW_pad, CH):
        xc = x_ref[:, :, start:start + CH].astype(jnp.float32)
        o_ref[:, :, start:start + CH] = (
            xc * cs * sa[:, None, start:start + CH]).astype(o_ref.dtype)


def _round_up(v, m):
    return -(-v // m) * m


def _vmem_budget():
    """(vmem_limit_cap_bytes, block_target_bytes), branched per TPU generation."""
    try:
        vmem = int(pltpu.get_tpu_info().vmem_capacity_bytes)
    except Exception:
        vmem = 64 << 20                    # unknown: assume v7x-class (64 MiB/TC)
    if vmem <= (64 << 20):                 # v7x: leave headroom for compiler scratch
        return 48 << 20, 4 << 20
    return 100 << 20, 10 << 20             # v5e / v6e: 128 MiB VMEM, bigger tiles


def _pick_nb(N, C, HW_pad, itemsize, target_bytes):
    """Largest divisor-of-N block <= target bytes, grid >= 2, prefer even grids."""
    per_img = max(1, C * HW_pad * itemsize)
    cap = max(1, target_bytes // per_img)
    cands = [d for d in range(1, N + 1)
             if N % d == 0 and d <= cap and (N < 2 or N // d >= 2)]
    if not cands:
        cands = [1]
    even = [d for d in cands if (N // d) % 2 == 0]   # balance v7x's two TCs
    return max(even) if even else max(cands)


def _build_weight_planes(wsp, H, W, HW_pad):
    """Boundary-masked 3x3 tap weights: (1, 18*HW_pad) f32, [9 avg taps | 9 max taps]."""
    idx = jnp.arange(HW_pad, dtype=jnp.int32)
    hh, ww = idx // W, idx % W
    planes = []
    for ci in range(2):
        for kh in range(3):
            for kw in range(3):
                oh, ow = kh - 1, kw - 1
                valid = ((hh + oh >= 0) & (hh + oh < H) &
                         (ww + ow >= 0) & (ww + ow < W))
                planes.append(jnp.where(valid, wsp[ci, kh, kw], 0.0))
    return jnp.concatenate(planes).reshape(1, 18 * HW_pad).astype(jnp.float32)


def cbam_pallas(x, w1, w2, wsp):
    """x: (N, C, H, W); w1: (Cr, C); w2: (C, Cr); wsp: (2, 3, 3) (OIHW, O squeezed)."""
    N, C, H, W = x.shape
    Cr = w1.shape[0]
    HW = H * W
    HW_pad = _round_up(HW, 128)            # lane-dense last dim

    x2 = x.reshape(N, C, HW)
    if HW_pad != HW:
        x2 = jnp.pad(x2, ((0, 0), (0, 0), (0, HW_pad - HW)))   # zero pad lanes

    vmem_cap, block_target = _vmem_budget()
    Nb = _pick_nb(N, C, HW_pad, x.dtype.itemsize, block_target)
    # TODO(synk): if a single image slab (C*HW_pad*4 + intermediates) ever exceeds
    # the per-core VMEM budget (very large feature maps on v7x), add a C-chunked
    # "arbitrary" grid axis with pool accumulators instead of keeping the whole
    # (C, HW) slab resident.

    CH = min(1024, HW_pad)                 # lane chunk size for the pass loops
    while HW_pad % CH:
        CH -= 128

    w1t = jnp.asarray(w1.T, jnp.float32)               # (C, Cr)
    w2t = jnp.asarray(w2.T, jnp.float32)               # (Cr, C)
    wplanes = _build_weight_planes(wsp, H, W, HW_pad)  # (1, 18*HW_pad)

    block_bytes = Nb * C * HW_pad * x.dtype.itemsize
    wp_bytes = 18 * HW_pad * 4
    # in + out double-buffered + small f32 intermediates (no x1 buffer).
    vmem_limit = int(min(vmem_cap,
                         max(16 << 20, 6 * block_bytes + 4 * wp_bytes + (2 << 20))))

    kernel = functools.partial(_cbam_kernel, W=W, HW=HW, CH=CH)
    out = pl.pallas_call(
        kernel,
        out_shape=jax.ShapeDtypeStruct((N, C, HW_pad), x.dtype),
        grid_spec=pltpu.PrefetchScalarGridSpec(
            num_scalar_prefetch=0,
            grid=(N // Nb,),
            in_specs=[
                pl.BlockSpec((Nb, C, HW_pad), lambda n: (n, 0, 0)),
                pl.BlockSpec((C, Cr), lambda n: (0, 0)),
                pl.BlockSpec((Cr, C), lambda n: (0, 0)),
                pl.BlockSpec((1, 18 * HW_pad), lambda n: (0, 0)),
            ],
            out_specs=pl.BlockSpec((Nb, C, HW_pad), lambda n: (n, 0, 0)),
        ),
        compiler_params=pltpu.CompilerParams(
            dimension_semantics=("parallel",),
            vmem_limit_bytes=vmem_limit),
    )(x2, w1t, w2t, wplanes)

    if HW_pad != HW:
        out = out[:, :, :HW]
    return out.reshape(N, C, H, W)


def cbam_ref(x, w1, w2, wsp):
    """Pure-JAX reference matching the PyTorch module semantics."""
    avg = x.mean(axis=(2, 3))                                  # (N, C)
    mx = x.max(axis=(2, 3))                                    # (N, C)

    def fc(v):
        return jnp.maximum(v @ w1.T, 0.0) @ w2.T

    ca = jax.nn.sigmoid(fc(avg) + fc(mx))[:, :, None, None]
    x1 = x * ca
    avg_s = x1.mean(axis=1, keepdims=True)
    max_s = x1.max(axis=1, keepdims=True)
    inp = jnp.concatenate([avg_s, max_s], axis=1)              # (N, 2, H, W)
    conv = jax.lax.conv_general_dilated(
        inp, wsp[None], window_strides=(1, 1), padding="SAME",
        dimension_numbers=("NCHW", "OIHW", "NCHW"))
    return x1 * jax.nn.sigmoid(conv)


if __name__ == "__main__":
    def make_case(key, N, C, H, W, ratio):
        Cr = max(1, C // ratio)
        kx, k1, k2, k3 = jax.random.split(key, 4)
        x = jax.random.normal(kx, (N, C, H, W), dtype=jnp.float32)
        w1 = jax.random.normal(k1, (Cr, C), dtype=jnp.float32) * 0.1   # Conv2d(C, Cr, 1, bias=False)
        w2 = jax.random.normal(k2, (C, Cr), dtype=jnp.float32) * 0.1   # Conv2d(Cr, C, 1, bias=False)
        wsp = jax.random.normal(k3, (2, 3, 3), dtype=jnp.float32) * 0.1  # Conv2d(2, 1, 3, pad=1, bias=False)
        return x, w1, w2, wsp

    k0, k1 = jax.random.split(jax.random.PRNGKey(0))
    cases = [
        make_case(k0, 2, 32, 16, 16, 16),   # module config: C=32, ratio=16, k=3
        make_case(k1, 3, 16, 14, 10, 4),    # non-square, HW not a 128-multiple (pad path)
    ]

    for x, w1, w2, wsp in cases:
        out = jax.block_until_ready(cbam_pallas(x, w1, w2, wsp))
        ref = jax.block_until_ready(cbam_ref(x, w1, w2, wsp))
        assert out.shape == x.shape, (out.shape, x.shape)
        err = float(jnp.max(jnp.abs(out - ref)))
        assert jnp.allclose(out, ref, atol=2e-3, rtol=2e-3), f"max abs err = {err}"
    print("KERNEL_OK")
</pallas_src>

<mosaic_0001>
module attributes {stable_mosaic.version = 11 : i64} {
  func.func @_cbam_kernel(%arg0: i32, %arg1: memref<1x32x256xf32, #tpu.memory_space<vmem>>, %arg2: memref<32x2xf32, #tpu.memory_space<vmem>>, %arg3: memref<2x32xf32, #tpu.memory_space<vmem>>, %arg4: memref<1x4608xf32, #tpu.memory_space<vmem>>, %arg5: memref<1x32x256xf32, #tpu.memory_space<vmem>>) attributes {dimension_semantics = [#tpu.dimension_semantics<parallel>], iteration_bounds = array<i64: 2>, scalar_prefetch = 0 : i64, scratch_operands = 0 : i64, tpu.core_type = #tpu.core_type<tc>, window_params = [{transform_indices = @transform_0, window_bounds = array<i64: 1, 32, 256>}, {pipeline_mode = #tpu.pipeline_mode<synchronous>, transform_indices = @transform_1, window_bounds = array<i64: 32, 2>}, {pipeline_mode = #tpu.pipeline_mode<synchronous>, transform_indices = @transform_2, window_bounds = array<i64: 2, 32>}, {pipeline_mode = #tpu.pipeline_mode<synchronous>, transform_indices = @transform_3, window_bounds = array<i64: 1, 4608>}, {transform_indices = @transform_4, window_bounds = array<i64: 1, 32, 256>}]} {
    %cst = arith.constant 0.000000e+00 : f32
    %0 = vector.broadcast %cst : f32 to vector<1x32xf32>
    %cst_0 = arith.constant -3.40282347E+38 : f32
    %1 = vector.broadcast %cst_0 : f32 to vector<1x32xf32>
    %c0 = arith.constant 0 : index
    %c0_1 = arith.constant 0 : index
    %c0_2 = arith.constant 0 : index
    %2 = vector.load %arg1[%c0, %c0_1, %c0_2] : memref<1x32x256xf32, #tpu.memory_space<vmem>>, vector<1x32x256xf32>
    %cst_3 = arith.constant dense<0.000000e+00> : vector<1x32xf32>
    %3 = vector.multi_reduction <add>, %2, %cst_3 [2] : vector<1x32x256xf32> to vector<1x32xf32>
    %4 = arith.addf %0, %3 : vector<1x32xf32>
    %cst_4 = arith.constant dense<0xFF800000> : vector<1x32xf32>
    %5 = vector.multi_reduction <maximumf>, %2, %cst_4 [2] : vector<1x32x256xf32> to vector<1x32xf32>
    %6 = arith.maximumf %1, %5 : vector<1x32xf32>
    %cst_5 = arith.constant 3.906250e-03 : f32
    %7 = vector.broadcast %cst_5 : f32 to vector<1x32xf32>
    %8 = arith.mulf %4, %7 : vector<1x32xf32>
    %9 = tpu.concatenate %8, %6 in 0 : vector<1x32xf32>, vector<1x32xf32> -> vector<2x32xf32>
    %c0_6 = arith.constant 0 : index
    %c0_7 = arith.constant 0 : index
    %10 = vector.load %arg2[%c0_6, %c0_7] : memref<32x2xf32, #tpu.memory_space<vmem>>, vector<32x2xf32>
    %cst_8 = arith.constant dense<0.000000e+00> : vector<2x2xf32>
    %11 = tpu.matmul %9, %10, %cst_8 {dimension_numbers = #tpu.dot_dimension_numbers<[1], [0], [0], [1], [0, 0, 1, 1], [], []>} : vector<2x32xf32>, vector<32x2xf32>, vector<2x2xf32> -> vector<2x2xf32>
    %cst_9 = arith.constant 0.000000e+00 : f32
    %12 = vector.broadcast %cst_9 : f32 to vector<2x2xf32>
    %13 = arith.maximumf %11, %12 : vector<2x2xf32>
    %c0_10 = arith.constant 0 : index
    %c0_11 = arith.constant 0 : index
    %14 = vector.load %arg3[%c0_10, %c0_11] : memref<2x32xf32, #tpu.memory_space<vmem>>, vector<2x32xf32>
    %cst_12 = arith.constant dense<0.000000e+00> : vector<2x32xf32>
    %15 = tpu.matmul %13, %14, %cst_12 {dimension_numbers = #tpu.dot_dimension_numbers<[1], [0], [0], [1], [0, 0, 1, 1], [], []>} : vector<2x2xf32>, vector<2x32xf32>, vector<2x32xf32> -> vector<2x32xf32>
    %16 = vector.extract_strided_slice %15 {offsets = [0, 0], sizes = [1, 32], strides = [1, 1]} : vector<2x32xf32> to vector<1x32xf32>
    %17 = vector.extract_strided_slice %15 {offsets = [1, 0], sizes = [1, 32], strides = [1, 1]} : vector<2x32xf32> to vector<1x32xf32>
    %18 = arith.addf %16, %17 : vector<1x32xf32>
    %19 = arith.negf %18 : vector<1x32xf32>
    %20 = math.exp %19 : vector<1x32xf32>
    %cst_13 = arith.constant 1.000000e+00 : f32
    %21 = vector.broadcast %cst_13 : f32 to vector<1x32xf32>
    %22 = arith.addf %21, %20 : vector<1x32xf32>
    %23 = arith.divf %21, %22 : vector<1x32xf32>
    %c0_14 = arith.constant 0 : index
    %c0_15 = arith.constant 0 : index
    %c0_16 = arith.constant 0 : index
    %24 = vector.load %arg1[%c0_14, %c0_15, %c0_16] : memref<1x32x256xf32, #tpu.memory_space<vmem>>, vector<1x32x256xf32>
    %25 = vector.shape_cast %23 : vector<1x32xf32> to vector<1x32x1xf32>
    %26 = vector.broadcast %25 : vector<1x32x1xf32> to vector<1x32x256xf32>
    %27 = arith.mulf %24, %26 : vector<1x32x256xf32>
    %cst_17 = arith.constant dense<0.000000e+00> : vector<1x256xf32>
    %28 = vector.multi_reduction <add>, %27, %cst_17 [1] : vector<1x32x256xf32> to vector<1x256xf32>
    %cst_18 = arith.constant 3.125000e-02 : f32
    %29 = vector.broadcast %cst_18 : f32 to vector<1x256xf32>
    %30 = arith.mulf %28, %29 : vector<1x256xf32>
    %cst_19 = arith.constant dense<0xFF800000> : vector<1x256xf32>
    %31 = vector.multi_reduction <maximumf>, %27, %cst_19 [1] : vector<1x32x256xf32> to vector<1x256xf32>
    %cst_20 = arith.constant 0.000000e+00 : f32
    %32 = vector.broadcast %cst_20 : f32 to vector<1x256xf32>
    %c0_21 = arith.constant 0 : index
    %c0_22 = arith.constant 0 : index
    %33 = vector.load %arg4[%c0_21, %c0_22] : memref<1x4608xf32, #tpu.memory_space<vmem>>, vector<1x256xf32>
    %c0_23 = arith.constant 0 : index
    %c2304 = arith.constant 2304 : index
    %34 = vector.load %arg4[%c0_23, %c2304] : memref<1x4608xf32, #tpu.memory_space<vmem>>, vector<1x256xf32>
    %c17_i32 = arith.constant 17 : i32
    %35 = tpu.dynamic_rotate %30 by %c17_i32 dim 1 : vector<1x256xf32>, i32 -> vector<1x256xf32>
    %36 = arith.mulf %35, %33 : vector<1x256xf32>
    %37 = arith.addf %32, %36 : vector<1x256xf32>
    %c17_i32_24 = arith.constant 17 : i32
    %38 = tpu.dynamic_rotate %31 by %c17_i32_24 dim 1 : vector<1x256xf32>, i32 -> vector<1x256xf32>
    %39 = arith.mulf %38, %34 : vector<1x256xf32>
    %40 = arith.addf %37, %39 : vector<1x256xf32>
    %c0_25 = arith.constant 0 : index
    %c256 = arith.constant 256 : index
    %41 = vector.load %arg4[%c0_25, %c256] : memref<1x4608xf32, #tpu.memory_space<vmem>>, vector<1x256xf32>
    %c0_26 = arith.constant 0 : index
    %c2560 = arith.constant 2560 : index
    %42 = vector.load %arg4[%c0_26, %c2560] : memref<1x4608xf32, #tpu.memory_space<vmem>>, vector<1x256xf32>
    %c16_i32 = arith.constant 16 : i32
    %43 = tpu.dynamic_rotate %30 by %c16_i32 dim 1 : vector<1x256xf32>, i32 -> vector<1x256xf32>
    %44 = arith.mulf %43, %41 : vector<1x256xf32>
    %45 = arith.addf %40, %44 : vector<1x256xf32>
    %c16_i32_27 = arith.constant 16 : i32
    %46 = tpu.dynamic_rotate %31 by %c16_i32_27 dim 1 : vector<1x256xf32>, i32 -> vector<1x256xf32>
    %47 = arith.mulf %46, %42 : vector<1x256xf32>
    %48 = arith.addf %45, %47 : vector<1x256xf32>
    %c0_28 = arith.constant 0 : index
    %c512 = arith.constant 512 : index
    %49 = vector.load %arg4[%c0_28, %c512] : memref<1x4608xf32, #tpu.memory_space<vmem>>, vector<1x256xf32>
    %c0_29 = arith.constant 0 : index
    %c2816 = arith.constant 2816 : index
    %50 = vector.load %arg4[%c0_29, %c2816] : memref<1x4608xf32, #tpu.memory_space<vmem>>, vector<1x256xf32>
    %c15_i32 = arith.constant 15 : i32
    %51 = tpu.dynamic_rotate %30 by %c15_i32 dim 1 : vector<1x256xf32>, i32 -> vector<1x256xf32>
    %52 = arith.mulf %51, %49 : vector<1x256xf32>
    %53 = arith.addf %48, %52 : vector<1x256xf32>
    %c15_i32_30 = arith.constant 15 : i32
    %54 = tpu.dynamic_rotate %31 by %c15_i32_30 dim 1 : vector<1x256xf32>, i32 -> vector<1x256xf32>
    %55 = arith.mulf %54, %50 : vector<1x256xf32>
    %56 = arith.addf %53, %55 : vector<1x256xf32>
    %c0_31 = arith.constant 0 : index
    %c768 = arith.constant 768 : index
    %57 = vector.load %arg4[%c0_31, %c768] : memref<1x4608xf32, #tpu.memory_space<vmem>>, vector<1x256xf32>
    %c0_32 = arith.constant 0 : index
    %c3072 = arith.constant 3072 : index
    %58 = vector.load %arg4[%c0_32, %c3072] : memref<1x4608xf32, #tpu.memory_space<vmem>>, vector<1x256xf32>
    %c1_i32 = arith.constant 1 : i32
    %59 = tpu.dynamic_rotate %30 by %c1_i32 dim 1 : vector<1x256xf32>, i32 -> vector<1x256xf32>
    %60 = arith.mulf %59, %57 : vector<1x256xf32>
    %61 = arith.addf %56, %60 : vector<1x256xf32>
    %c1_i32_33 = arith.constant 1 : i32
    %62 = tpu.dynamic_rotate %31 by %c1_i32_33 dim 1 : vector<1x256xf32>, i32 -> vector<1x256xf32>
    %63 = arith.mulf %62, %58 : vector<1x256xf32>
    %64 = arith.addf %61, %63 : vector<1x256xf32>
    %c0_34 = arith.constant 0 : index
    %c1024 = arith.constant 1024 : index
    %65 = vector.load %arg4[%c0_34, %c1024] : memref<1x4608xf32, #tpu.memory_space<vmem>>, vector<1x256xf32>
    %c0_35 = arith.constant 0 : index
    %c3328 = arith.constant 3328 : index
    %66 = vector.load %arg4[%c0_35, %c3328] : memref<1x4608xf32, #tpu.memory_space<vmem>>, vector<1x256xf32>
    %67 = arith.mulf %30, %65 : vector<1x256xf32>
    %68 = arith.addf %64, %67 : vector<1x256xf32>
    %69 = arith.mulf %31, %66 : vector<1x256xf32>
    %70 = arith.addf %68, %69 : vector<1x256xf32>
    %c0_36 = arith.constant 0 : index
    %c1280 = arith.constant 1280 : index
    %71 = vector.load %arg4[%c0_36, %c1280] : memref<1x4608xf32, #tpu.memory_space<vmem>>, vector<1x256xf32>
    %c0_37 = arith.constant 0 : index
    %c3584 = arith.constant 3584 : index
    %72 = vector.load %arg4[%c0_37, %c3584] : memref<1x4608xf32, #tpu.memory_space<vmem>>, vector<1x256xf32>
    %c255_i32 = arith.constant 255 : i32
    %73 = tpu.dynamic_rotate %30 by %c255_i32 dim 1 : vector<1x256xf32>, i32 -> vector<1x256xf32>
    %74 = arith.mulf %73, %71 : vector<1x256xf32>
    %75 = arith.addf %70, %74 : vector<1x256xf32>
    %c255_i32_38 = arith.constant 255 : i32
    %76 = tpu.dynamic_rotate %31 by %c255_i32_38 dim 1 : vector<1x256xf32>, i32 -> vector<1x256xf32>
    %77 = arith.mulf %76, %72 : vector<1x256xf32>
    %78 = arith.addf %75, %77 : vector<1x256xf32>
    %c0_39 = arith.constant 0 : index
    %c1536 = arith.constant 1536 : index
    %79 = vector.load %arg4[%c0_39, %c1536] : memref<1x4608xf32, #tpu.memory_space<vmem>>, vector<1x256xf32>
    %c0_40 = arith.constant 0 : index
    %c3840 = arith.constant 3840 : index
    %80 = vector.load %arg4[%c0_40, %c3840] : memref<1x4608xf32, #tpu.memory_space<vmem>>, vector<1x256xf32>
    %c241_i32 = arith.constant 241 : i32
    %81 = tpu.dynamic_rotate %30 by %c241_i32 dim 1 : vector<1x256xf32>, i32 -> vector<1x256xf32>
    %82 = arith.mulf %81, %79 : vector<1x256xf32>
    %83 = arith.addf %78, %82 : vector<1x256xf32>
    %c241_i32_41 = arith.constant 241 : i32
    %84 = tpu.dynamic_rotate %31 by %c241_i32_41 dim 1 : vector<1x256xf32>, i32 -> vector<1x256xf32>
    %85 = arith.mulf %84, %80 : vector<1x256xf32>
    %86 = arith.addf %83, %85 : vector<1x256xf32>
    %c0_42 = arith.constant 0 : index
    %c1792 = arith.constant 1792 : index
    %87 = vector.load %arg4[%c0_42, %c1792] : memref<1x4608xf32, #tpu.memory_space<vmem>>, vector<1x256xf32>
    %c0_43 = arith.constant 0 : index
    %c4096 = arith.constant 4096 : index
    %88 = vector.load %arg4[%c0_43, %c4096] : memref<1x4608xf32, #tpu.memory_space<vmem>>, vector<1x256xf32>
    %c240_i32 = arith.constant 240 : i32
    %89 = tpu.dynamic_rotate %30 by %c240_i32 dim 1 : vector<1x256xf32>, i32 -> vector<1x256xf32>
    %90 = arith.mulf %89, %87 : vector<1x256xf32>
    %91 = arith.addf %86, %90 : vector<1x256xf32>
    %c240_i32_44 = arith.constant 240 : i32
    %92 = tpu.dynamic_rotate %31 by %c240_i32_44 dim 1 : vector<1x256xf32>, i32 -> vector<1x256xf32>
    %93 = arith.mulf %92, %88 : vector<1x256xf32>
    %94 = arith.addf %91, %93 : vector<1x256xf32>
    %c0_45 = arith.constant 0 : index
    %c2048 = arith.constant 2048 : index
    %95 = vector.load %arg4[%c0_45, %c2048] : memref<1x4608xf32, #tpu.memory_space<vmem>>, vector<1x256xf32>
    %c0_46 = arith.constant 0 : index
    %c4352 = arith.constant 4352 : index
    %96 = vector.load %arg4[%c0_46, %c4352] : memref<1x4608xf32, #tpu.memory_space<vmem>>, vector<1x256xf32>
    %c239_i32 = arith.constant 239 : i32
    %97 = tpu.dynamic_rotate %30 by %c239_i32 dim 1 : vector<1x256xf32>, i32 -> vector<1x256xf32>
    %98 = arith.mulf %97, %95 : vector<1x256xf32>
    %99 = arith.addf %94, %98 : vector<1x256xf32>
    %c239_i32_47 = arith.constant 239 : i32
    %100 = tpu.dynamic_rotate %31 by %c239_i32_47 dim 1 : vector<1x256xf32>, i32 -> vector<1x256xf32>
    %101 = arith.mulf %100, %96 : vector<1x256xf32>
    %102 = arith.addf %99, %101 : vector<1x256xf32>
    %103 = arith.negf %102 : vector<1x256xf32>
    %104 = math.exp %103 : vector<1x256xf32>
    %cst_48 = arith.constant 1.000000e+00 : f32
    %105 = vector.broadcast %cst_48 : f32 to vector<1x256xf32>
    %106 = arith.addf %105, %104 : vector<1x256xf32>
    %107 = arith.divf %105, %106 : vector<1x256xf32>
    %108 = vector.shape_cast %23 : vector<1x32xf32> to vector<1x32x1xf32>
    %c0_49 = arith.constant 0 : index
    %c0_50 = arith.constant 0 : index
    %c0_51 = arith.constant 0 : index
    %109 = vector.load %arg1[%c0_49, %c0_50, %c0_51] : memref<1x32x256xf32, #tpu.memory_space<vmem>>, vector<1x32x256xf32>
    %110 = vector.broadcast %108 : vector<1x32x1xf32> to vector<1x32x256xf32>
    %111 = arith.mulf %109, %110 : vector<1x32x256xf32>
    %112 = vector.shape_cast %107 : vector<1x256xf32> to vector<1x1x256xf32>
    %113 = vector.broadcast %112 : vector<1x1x256xf32> to vector<1x32x256xf32>
    %114 = arith.mulf %111, %113 : vector<1x32x256xf32>
    %c0_52 = arith.constant 0 : index
    %c0_53 = arith.constant 0 : index
    %c0_54 = arith.constant 0 : index
    %115 = vector.load %arg5[%c0_52, %c0_53, %c0_54] : memref<1x32x256xf32, #tpu.memory_space<vmem>>, vector<1x32x256xf32>
    tpu.vector_store %arg5[%c0_52, %c0_53, %c0_54], %114 {strides = array<i32>} : memref<1x32x256xf32, #tpu.memory_space<vmem>>, vector<1x32x256xf32>,
    return
  }
  func.func @transform_0(%arg0: i32) -> (i32, i32, i32) {
    %c0_i32 = arith.constant 0 : i32
    %c0_i32_0 = arith.constant 0 : i32
    %c0_i32_1 = arith.constant 0 : i32
    return %arg0, %c0_i32, %c0_i32_0 : i32, i32, i32
  }
  func.func @transform_1(%arg0: i32) -> (i32, i32) {
    %c0_i32 = arith.constant 0 : i32
    %c0_i32_0 = arith.constant 0 : i32
    %c0_i32_1 = arith.constant 0 : i32
    return %c0_i32, %c0_i32_0 : i32, i32
  }
  func.func @transform_2(%arg0: i32) -> (i32, i32) {
    %c0_i32 = arith.constant 0 : i32
    %c0_i32_0 = arith.constant 0 : i32
    %c0_i32_1 = arith.constant 0 : i32
    return %c0_i32, %c0_i32_0 : i32, i32
  }
  func.func @transform_3(%arg0: i32) -> (i32, i32) {
    %c0_i32 = arith.constant 0 : i32
    %c0_i32_0 = arith.constant 0 : i32
    %c0_i32_1 = arith.constant 0 : i32
    return %c0_i32, %c0_i32_0 : i32, i32
  }
  func.func @transform_4(%arg0: i32) -> (i32, i32, i32) {
    %c0_i32 = arith.constant 0 : i32
    %c0_i32_0 = arith.constant 0 : i32
    %c0_i32_1 = arith.constant 0 : i32
    return %arg0, %c0_i32, %c0_i32_0 : i32, i32, i32
  }
}

</mosaic_0001>

<bundles_post_ra>
// kernel: tpu_custom_call.1
= control target key start
LH: loop header
LB: loop body
LE: loop exit
PB: predicated region body
PF: predicated region fallthrough
CT: control target
= control target key end

     0   :  { %9 = vsyncpa [#allocation3], 0  ;;  %s1831_s0 = inlined_call_operand.hbm [shape: f32[2,32,256], index: 0, kind: input, shape index: {}]   ;;  %s1832_s1 = inlined_call_operand.vmem [shape: f32[32,2], index: 1, kind: input, shape index: {}]   ;;  %s1833_s2 = inlined_call_operand.vmem [shape: f32[2,32], index: 2, kind: input, shape index: {}]   ;;  %s1834_s3 = inlined_call_operand.vmem [shape: f32[1,4608], index: 3, kind: input, shape index: {}]   ;;  %s1835_s4 = inlined_call_operand.hbm [shape: f32[2,32,256], index: 4, kind: output, shape index: {}]  }
   0x1   :  { %11 = vsyncpa [#allocation3 + $0x1], 0 }
   0x2   :  { %12 = vsyncpa [#allocation4], 0 }
   0x3   :  { %14 = vsyncpa [#allocation4 + $0x1], 0  ;;  %s1328_s15 = smov 0   ;;  %s1330_s16 = smov 0  }
   0x4   :  { %s1332_s17 = smov 0   ;;  %s1334_s18 = smov 0  }
   0x5 LB: > { %s1349_s19 = sadd.s32 4294967295, %s1285_s18   ;;  %s1066_s20 = sadd.s32 4294967294, %s1285_s18   ;;  %s1285_s18 = sphi %s1334_s18, %s1848_s18   ;;  %s1281_s17 = sphi %s1332_s17, %s1847_s17   ;;  %s1277_s16 = sphi %s1330_s16, %s1846_s16   ;;  %s1273_s15 = sphi %s1328_s15, %s1845_s15  }
   0x6   : > { %s1353_s21 = sadd.s32 1, %s1285_s18   ;;  %s27_s22 = sadd.s32 1, %s1281_s17 }
   0x7   : > { %s24_s23 = ssub.s32 %s1285_s18, %s1353_s21  ;;  %p34_p0 = scmp.ne.s32.totalorder %s1281_s17, %s1277_s16 }
   0x8   : > { %p25_p1 = scmp.eq.s32.totalorder %s24_s23, 0  ;;  %p35_p2 = scmp.eq.s32.totalorder %s1285_s18, 0 }
   0x9   : > { %p40_p3 = scmp.ne.s32.totalorder %s1277_s16, %s1273_s15  ;;  %p41_p4 = scmp.eq.s32.totalorder %s1349_s19, 0 }
   0xa   : > { %s1365_s24 = scalar_select %p25_p1, %s1281_s17, %s27_s22  }
   0xb   : > { %p1367_p5 = por %p35_p2, %p34_p0  ;;  %p1371_p6 = por %p41_p4, %p40_p3 }
   0xc   : > { %p127_p7 = scmp.eq.s32.totalorder %s1349_s19, 1  ;;  %p133_p8 = scmp.eq.s32.totalorder %s1066_s20, 1 }
   0xd   : > { %p1129_p10 = scmp.lt.s32.totalorder %s1285_s18, 2  ;;  %s162_s29 = sand.u32 1, %s1281_s17  }
   0xe   : > { %p1378_p11 = por %p127_p7, %p34_p0  ;;  %p1382_p12 = por %p133_p8, %p40_p3 }
   0xf   : > { %s1086_s30 = sshll.u32 %s1285_s18, 10  ;;  %s1069_s5 = sshll.u32 %s162_s29, 6 }
  0x10   : > { %s1839_s27 = scalar_select %p1378_p11, 1, 0 }
  0x11   : > { %s1840_s28 = scalar_select %p1382_p12, 1, 0 }
  0x12   : > { %s1391_s8 = scalar_lea.hbm %s1831_s0, %s1086_s30  ;;  %s166_s9 = scalar_lea.vmem [#allocation2], %s1069_s5 }
  0x13   : > { %s173_s10 = sshll.u32 %s166_s9, 4  ;;  %p1395_p13 = pnand %p1129_p10, %p1367_p5  ;;  %s1399_s10 = int_to_ptr.vmem [resolvable:$true] %s173_s10 }
  0x14   : > { %s1401_s12 = scalar_lea.sflag [#allocation3], %s162_s29  ;;  %s1189_s13 = scalar_lea.hbm %s1391_s8, 1024 }
  0x15   : > { %p1190_p0 = scmp.ne.s32.totalorder %s1391_s8, %s1189_s13  ;;  %p1191_p1 = pneg %p1395_p13 }
  0x16   : > { %s1194_s22 = scalar_lea.hbm %s1831_s0, 2048  ;;  %p1195_p4 = scmp.lt.u32.totalorder %s1391_s8, %s1831_s0 }
  0x17   : > { %p1192_p2 = pnand %p1191_p1, %p1190_p0  ;;  %p1196_p5 = scmp.lt.u32.totalorder %s1194_s22, %s1189_s13 }
  0x18   : > { %p1198_p8 = scmp.lt.u32.totalorder %s1189_s13, %s1391_s8 }
  0x19   : > { %p1193_p3 = pneg %p1192_p2  ;;  %p1197_p7 = por %p1196_p5, %p1195_p4 }
  0x1b   : > { %p1199_p10 = por %p1198_p8, %p1197_p7 }
  0x1d   : > { %p1200_p9 = pnand %p1199_p10, %p1193_p3 }
  0x1f   : > { %1203 = shalt.err (!%p1200_p9)
}
  0x20   : > { %s1204_s29 = scalar_lea.vmem %s1399_s10, 1024  ;;  %s1287_s30 = smov [#allocation2]  }
  0x21   : > { %p1205_p0 = scmp.ne.s32.totalorder %s1399_s10, %s1204_s29  ;;  %s1209_s5 = sshll.u32 %s1287_s30, 4  ;;  %s1210_s5 = int_to_ptr.vmem [resolvable:$false] %s1209_s5 }
  0x22   : > { %s1211_s6 = scalar_lea.vmem %s1210_s5, 2048  ;;  %p1212_p11 = scmp.lt.s32.totalorder %s1399_s10, %s1210_s5 }
  0x23   : > { %p1207_p2 = pnand %p1205_p0, %p1191_p1  ;;  %p1213_p4 = scmp.lt.s32.totalorder %s1211_s6, %s1204_s29 }
  0x25   : > { %p1208_p12 = pneg %p1207_p2  ;;  %p1214_p5 = por %p1213_p4, %p1212_p11 }
  0x27   : > { %p1215_p7 = pnand %p1214_p5, %p1208_p12 }
  0x29   : > { %1218 = shalt.err (!%p1215_p7)
}
  0x2a   : > { %s1288_s7 = smov 256   ;;  %s1289_s9 = smov 16  }
  0x2b   : > { %1124 = dma.hbm_to_vmem [thread:$0]  (!%p1395_p13), %s1391_s8, 1024, %s1399_s10, %s1401_s12, %s1288_s7, %s1288_s7, %s1289_s9  }
  0x2c   : > { %p1072_p9 = scmp.ge.s32.totalorder %s1285_s18, 1  ;;  %p181_p1 = scmp.lt.s32.totalorder %s1285_s18, 3 }
  0x2e   : > { %p182_p3 = pnand %p1072_p9, %p181_p1 }
  0x2f   : > { %s1432_s13 = sand.u32 (!%p182_p3), 1, %s1277_s16  }
  0x30   : > { %185 = sbr.rel (%p182_p3) target bundleno = 1046 (0x416), region = 36  ;;  %s1073_s14 = sshll.u32 (!%p182_p3), %s1432_s13, 6 }
  0x31   : > { %s188_s20 = scalar_lea.sflag (!%p182_p3), [#allocation3], %s1432_s13  ;;  %s191_s22 = scalar_lea.vmem (!%p182_p3), [#allocation2], %s1073_s14 }
  0x37   : > { %1264 = dma.done.wait (%p1371_p6), %s188_s20, 1024  }
  0x38   : > { %1266 = vsyncadd (%p1371_p6), %s188_s20, 4294966272  ;;  %v1442_v0 = vld [vmem:[%s191_s22] sm:$0xff]  ;;  %v1444_v1 = vld [vmem:[%s191_s22 + $0x8] sm:$0xff]  ;;  %v1290_v19 = vmov 0.0|0.0   ;;  %vm1291_vm0 = vmmov 0   ;;  %v1292_v23 = vmov 0.0   ;;  %v264_v24 = vlaneseq }
  0x39   : > { %v1446_v2 = vld [vmem:[%s191_s22 + $0x10] sm:$0xff]  ;;  %v240_v3 = vmax.f32 %v1442_v0, %v1444_v1  ;;  %v224_v4 = vadd.f32 %v1444_v1, %v1442_v0  ;;  %v1452_v5 = vld [vmem:[%s191_s22 + $0x18] sm:$0xff]  ;;  %v1458_v8 = vld [vmem:[%s191_s22 + $0x20] sm:$0xff]  ;;  %1111 = vmatprep.subr.bf16.mxu0 %v1290_v19  ;;  %1103 = vmatprep.mubr.msk.f32.mxu0 %vm1291_vm0, %v1292_v23  ;;  %vm275_vm1 = vcmask 130112   ;;  %vm282_vm2 = vcmask 195712   ;;  %s1294_s26 = smov 16  }
  0x3a   : > { %v243_v6 = vmax.f32 %v1446_v2, %v1452_v5  ;;  %v227_v7 = vadd.f32 %v1452_v5, %v1446_v2  ;;  %v1460_v9 = vld [vmem:[%s191_s22 + $0x28] sm:$0xff]  ;;  %v1466_v12 = vld [vmem:[%s191_s22 + $0x30] sm:$0xff]  ;;  %v1468_v13 = vld [vmem:[%s191_s22 + $0x38] sm:$0xff]  ;;  %1106 = vmatprep.subr.mxu1 %v1292_v23  ;;  %1108 = vmatprep.mubr.msk.f32.mxu1 %vm1291_vm0, %v1292_v23  ;;  %v1486_v27 = vand.u32 127, %v264_v24  ;;  %v1489_v29 = vshrl.u32 %v264_v24, 7  ;;  %s1293_s22 = smov 17  }
  0x3b   : > { %241 = vmax.xlane.f32.xlu1 %v240_v3  ;;  %225 = vadd.xlane.f32.xlu0 %v224_v4  ;;  %v246_v10 = vmax.f32 %v1458_v8, %v1460_v9  ;;  %v230_v11 = vadd.f32 %v1460_v9, %v1458_v8  ;;  %v249_v14 = vmax.f32 %v1466_v12, %v1468_v13  ;;  %v318_v16 = vld [vmem:[%s1832_s1] sm:$0xff]  ;;  %v319_v17 = vld [vmem:[%s1832_s1 + $0x8] sm:$0xff]  ;;  %v320_v20 = vld [vmem:[%s1832_s1 + $0x10] sm:$0xff]  ;;  %vm289_vm3 = vcmask 261312   ;;  %s1295_s8 = smov 15   ;;  %s1296_s10 = smov 1  }
  0x3c   : > { %v233_v15 = vadd.f32 %v1468_v13, %v1466_v12  ;;  %v1112_v18 = vpack.c.bf16 %v319_v17, %v318_v16  ;;  %v321_v21 = vld [vmem:[%s1832_s1 + $0x18] sm:$0xff]  ;;  %v270_v28 = vadd.s32 4294967288, %v1486_v27  ;;  %v277_v32 = vadd.s32 4294967280, %v1486_v27  ;;  %v397_v4 = vld [vmem:[%s1833_s2] sm:$0x3]  ;;  %s1297_s11 = smov 127  }
  0x3d   : > { %v1115_v22 = vpack.c.bf16 %v321_v21, %v320_v20  ;;  %v284_v36 = vadd.s32 4294967272, %v1486_v27  ;;  %v268_v37 = vsub.s32 %v1486_v27, %v1489_v29  ;;  %vm316_vm4 = vcmask 1040384   ;;  %s1298_s12 = smov 113   ;;  %s1299_s23 = smov 112  }
  0x3e   : > { %1113 = vmatpush3.bf16.msra.mxu0 %v1112_v18  ;;  %v273_v33 = vsub.s32 %v270_v28, %v1489_v29  ;;  %v280_v38 = vsub.s32 %v277_v32, %v1489_v29  ;;  %vm322_vm5 = vcmask 261120   ;;  %vm402_vm6 = vcmask 1041408   ;;  %s1300_s25 = smov 111   ;;  %s1087_s7 = sshll.u32 %s1349_s19, 10 }
  0x3f   : > { %244 = vmax.xlane.f32.xlu1 %v243_v6  ;;  %228 = vadd.xlane.f32.xlu0 %v227_v7  ;;  %v287_v47 = vsub.s32 %v284_v36, %v1489_v29  ;;  %vm398_vm7 = vcmask 15360   ;;  %v1504_v20 = vsub.s32 0, %v1489_v29  ;;  %vm557_vm8 = vcmp.lt.s32.totalorder %v1486_v27, 17  ;;  %s215_s9 = scalar_lea.vmem [#allocation5], %s1073_s14  ;;  %s1780_s19 = scalar_lea.hbm %s1835_s4, %s1087_s7 }
  0x40   : > { %1114 = vmatprep.subr.bf16.mxu0 %v1290_v19  ;;  %1107 = vmatpush3.msk.msra.mxu1 %vm402_vm6, %v397_v4  ;;  %vm602_vm9 = vcmp.lt.s32.totalorder %v1486_v27, 16  ;;  %vm647_vm10 = vcmp.lt.s32.totalorder %v1486_v27, 15  ;;  %vm692_vm11 = vcmp.lt.s32.totalorder %v1486_v27, 1  ;;  %vm769_vm12 = vcmp.lt.s32.totalorder %v1486_v27, 127  ;;  %s993_s20 = sshll.u32 %s215_s9, 4  ;;  %s980_s14 = scalar_lea.sflag [#allocation4], %s1432_s13  ;;  %s1786_s20 = int_to_ptr.vmem [resolvable:$true] %s993_s20 }
  0x41   : > { %vm814_vm13 = vcmp.lt.s32.totalorder %v1486_v27, 113  ;;  %vm859_vm14 = vcmp.lt.s32.totalorder %v1486_v27, 112  ;;  %vm904_vm15 = vcmp.lt.s32.totalorder %v1486_v27, 111  ;;  %p1842_p11 = scmp.ne.s32.totalorder %s1839_s27, 0 }
  0x42   : > { %1116 = vmatpush3.bf16.msra.mxu0 %v1115_v22 }
  0x43   : > { %247 = vmax.xlane.f32.xlu1 %v246_v10  ;;  %231 = vadd.xlane.f32.xlu0 %v230_v11 }
  0x47   : > { %250 = vmax.xlane.f32.xlu1 %v249_v14  ;;  %234 = vadd.xlane.f32.xlu0 %v233_v15 }
  0xc8   : > { %v242_v25 = vpop.xlane.xlu1 %241  ;;  %v226_v26 = vpop.xlane.xlu0 %225 }
  0xc9   : > { %v252_v41 = vmax.f32 %v242_v25, -3.4028235e+38  ;;  %v256_v42 = vmul.f32 0.00390625, %v226_v26 }
  0xcb   : > { %v299_v52 = vrot.slane %v252_v41, %v268_v37  ;;  %v269_v53 = vrot.slane %v256_v42, %v268_v37 }
  0xcc   : > { %v245_v30 = vpop.xlane.xlu1 %244  ;;  %v229_v31 = vpop.xlane.xlu0 %228 }
  0xcd   : > { %v253_v34 = vmax.f32 %v245_v30, -3.4028235e+38  ;;  %v257_v35 = vmul.f32 0.00390625, %v229_v31 }
  0xcf   : > { %v303_v45 = vrot.slane %v253_v34, %v273_v33  ;;  %v274_v46 = vrot.slane %v257_v35, %v273_v33 }
  0xd0   : > { %v248_v39 = vpop.xlane.xlu1 %247  ;;  %v232_v40 = vpop.xlane.xlu0 %231 }
  0xd1   : > { %v254_v43 = vmax.f32 %v248_v39, -3.4028235e+38  ;;  %v258_v44 = vmul.f32 0.00390625, %v232_v40  ;;  %v304_v56 = vsel %vm275_vm1, %v303_v45, %v299_v52  ;;  %v276_v57 = vsel %vm275_vm1, %v274_v46, %v269_v53  ;;  %v1557_v52 = vld [vmem:[%s1834_s3 + $0x1a] sm:$0x3] }
  0xd2   : > { %v1546_v46 = vsub.s32 1, %v1489_v29 }
  0xd3   : > { %v308_v48 = vrot.slane %v254_v43, %v280_v38  ;;  %v281_v49 = vrot.slane %v258_v44, %v280_v38 }
  0xd4   : > { %v251_v50 = vpop.xlane.xlu1 %250  ;;  %v235_v51 = vpop.xlane.xlu0 %234 }
  0xd5   : > { %v255_v54 = vmax.f32 %v251_v50, -3.4028235e+38  ;;  %v259_v55 = vmul.f32 0.00390625, %v235_v51  ;;  %v309_v60 = vsel %vm282_vm2, %v308_v48, %v304_v56  ;;  %v283_v61 = vsel %vm282_vm2, %v281_v49, %v276_v57  ;;  %v1552_v51 = vld [vmem:[%s1834_s3 + $0x8] sm:$0x3] }
  0xd6   : > { %v741_v56 = vrot.slane %v1552_v51, %v1546_v46 }
  0xd7   : > { %v313_v58 = vrot.slane %v255_v54, %v287_v47  ;;  %v288_v59 = vrot.slane %v259_v55, %v287_v47 }
  0xd9   : > { %v290_v62 = vsel %vm289_vm3, %v288_v59, %v283_v61  ;;  %v314_v63 = vsel %vm289_vm3, %v313_v58, %v309_v60  ;;  %v756_v60 = vrot.slane %v1557_v52, %v1546_v46 }
  0xda   : > { %v317_v3 = vsel %vm316_vm4, %v290_v62, %v314_v63 }
  0xdb   : > { %1104 = vmatmul.mubr.msk.f32.vlgmr.msra.gmra.mrb[0].mxu0 %vm322_vm5, %v317_v3 }
 0x1ae   : > { %v392_v6 = vpop.f32.mrb[0].mxu0 }
 0x1af   : > { %v396_v7 = vmax.f32 %v392_v6, 0.0  ;;  %v1105_v10 = vpop.f32.mrb[1].mxu0 }
 0x1b1   : > { %1109 = vmatmul.mubr.msk.f32.vlgmr.msra.gmra.mrb[0].mxu1 %vm398_vm7, %v396_v7 }
 0x284   : > { %v472_v11 = vpop.f32.mrb[0].mxu1 }
 0x285   : > { %v477_v14 = vrot.slane %v472_v11, 1  ;;  %v1110_v15 = vpop.f32.mrb[1].mxu1 }
 0x287   : > { %v479_v16 = vadd.f32 %v477_v14, %v472_v11 }
 0x289   : > { %v1078_v17 = vmul.f32 -1.442695, %v479_v16 }
 0x28b   : > { %1177 = vpow2.f32 %v1078_v17 }
 0x295   : > { %v1178_v18 = vpop.eup %1177 }
 0x296   : > { %v483_v19 = vadd.f32 1.0, %v1178_v18 }
 0x298   : > { %1179 = vrcp.f32 %v483_v19 }
 0x2a2   : > { %v1180_v21 = vpop.eup %1179 }
 0x2a3   : > { %v489_v22 = vrot.slane %v1180_v21, %v1504_v20 }
 0x2a5   : > { %495 = vbcast.lane.b32.xlu1 %v489_v22, 264  ;;  %491 = vbcast.lane.b32.xlu0 %v489_v22, 256 }
 0x2a9   : > { %499 = vbcast.lane.b32.xlu1 %v489_v22, 272 }
 0x2ad   : > { %503 = vbcast.lane.b32.xlu1 %v489_v22, 280 }
 0x317   : > { %v496_v23 = vpop.permute.xlu1 %495  ;;  %v492_v24 = vpop.permute.xlu0 %491 }
 0x318   : > { %v1508_v25 = vmul.f32 %v496_v23, %v1452_v5  ;;  %v1511_v26 = vmul.f32 %v492_v24, %v1444_v1  ;;  %v1522_v33 = vmul.f32 %v492_v24, %v1442_v0  ;;  %v1525_v5 = vmul.f32 %v496_v23, %v1446_v2 }
 0x31a   : > { %v522_v32 = vadd.f32 %v1508_v25, %v1511_v26  ;;  %v513_v42 = vadd.f32 %v1525_v5, %v1522_v33 }
 0x31b   : > { %v500_v28 = vpop.permute.xlu1 %499 }
 0x31c   : > { %v1514_v30 = vmul.f32 %v500_v28, %v1460_v9  ;;  %v1517_v31 = vmul.f32 %v500_v28, %v1458_v8 }
 0x31e   : > { %v523_v1 = vadd.f32 %v522_v32, %v1514_v30  ;;  %v533_v8 = vmax.f32 %v1522_v33, %v1517_v31  ;;  %v542_v36 = vmax.f32 %v1511_v26, %v1514_v30  ;;  %v514_v47 = vadd.f32 %v513_v42, %v1517_v31 }
 0x31f   : > { %v504_v34 = vpop.permute.xlu1 %503 }
 0x320   : > { %v1529_v35 = vmul.f32 %v504_v34, %v1466_v12  ;;  %v1532_v9 = vmul.f32 %v504_v34, %v1468_v13 }
 0x322   : > { %v524_v0 = vadd.f32 %v523_v1, %v1532_v9  ;;  %v534_v2 = vmax.f32 %v1525_v5, %v1529_v35  ;;  %v543_v37 = vmax.f32 %v1508_v25, %v1532_v9  ;;  %v515_v53 = vadd.f32 %v514_v47, %v1529_v35  ;;  %v551_v1 = vld [vmem:[%s1834_s3] sm:$0x3] }
 0x324   : > { %v525_v38 = vrot.slane %v524_v0, 4  ;;  %v535_v12 = vmax.f32 %v533_v8, %v534_v2  ;;  %v544_v39 = vmax.f32 %v542_v36, %v543_v37  ;;  %v516_v61 = vrot.slane %v515_v53, 4 }
 0x325   : > { %v564_v2 = vrot.slane %v551_v1, %v1504_v20  ;;  %v568_v37 = vrot.slane %v551_v1, %v1546_v46 }
 0x326   : > { %v526_v40 = vadd.f32 %v525_v38, %v524_v0  ;;  %v536_v13 = vrot.slane %v535_v12, 4  ;;  %v545_v41 = vrot.slane %v544_v39, 4  ;;  %v517_v7 = vadd.f32 %v516_v61, %v515_v53  ;;  %v552_v0 = vld [vmem:[%s1834_s3 + $0x12] sm:$0x3]  ;;  %v596_v38 = vld [vmem:[%s1834_s3 + $0x2] sm:$0x3] }
 0x327   : > { %v609_v53 = vrot.slane %v596_v38, %v1504_v20 }
 0x328   : > { %v527_v43 = vrot.slane %v526_v40, 2  ;;  %v537_v44 = vmax.f32 %v535_v12, %v536_v13  ;;  %v546_v45 = vmax.f32 %v544_v39, %v545_v41  ;;  %v518_v10 = vrot.slane %v517_v7, 2  ;;  %v642_v13 = vld [vmem:[%s1834_s3 + $0x16] sm:$0x3] }
 0x329   : > { %v585_v12 = vrot.slane %v552_v0, %v1504_v20  ;;  %v589_v39 = vrot.slane %v552_v0, %v1546_v46  ;;  %v679_v0 = vrot.slane %v642_v13, %v1546_v46 }
 0x32a   : > { %v528_v48 = vadd.f32 %v527_v43, %v526_v40  ;;  %v538_v49 = vrot.slane %v537_v44, 2  ;;  %v547_v50 = vrot.slane %v546_v45, 2  ;;  %v519_v11 = vadd.f32 %v518_v10, %v517_v7  ;;  %v597_v40 = vld [vmem:[%s1834_s3 + $0x14] sm:$0x3] }
 0x32c   : > { %v529_v54 = vrot.slane %v528_v48, 1  ;;  %v539_v29 = vmax.f32 %v537_v44, %v538_v49  ;;  %v548_v55 = vmax.f32 %v546_v45, %v547_v50  ;;  %v520_v14 = vrot.slane %v519_v11, 1 }
 0x32e   : > { %v530_v57 = vadd.f32 %v529_v54, %v528_v48  ;;  %v540_v58 = vrot.slane %v539_v29, 1  ;;  %v549_v59 = vrot.slane %v548_v55, 1  ;;  %v521_v15 = vadd.f32 %v520_v14, %v519_v11  ;;  %v641_v48 = vld [vmem:[%s1834_s3 + $0x4] sm:$0x3] }
 0x32f   : > { %v613_v54 = vrot.slane %v596_v38, %v1546_v46  ;;  %v654_v61 = vrot.slane %v641_v48, %v1504_v20 }
 0x330   : > { %v532_v62 = vmul.f32 0.03125, %v530_v57  ;;  %v1564_v63 = vmax.f32 %v539_v29, %v540_v58  ;;  %v550_v3 = vmax.f32 %v548_v55, %v549_v59  ;;  %v1578_v16 = vmul.f32 0.03125, %v521_v15 }
 0x331   : > { %v630_v29 = vrot.slane %v597_v40, %v1504_v20  ;;  %v634_v55 = vrot.slane %v597_v40, %v1546_v46 }
 0x332   : > { %577 = vrot.lane.b32.xlu1 %v550_v3, %s1293_s22  ;;  %575 = vrot.lane.b32.xlu0 %v1564_v63, %s1293_s22  ;;  %v1567_v4 = vmul.f32 %v741_v56, %v532_v62  ;;  %v1569_v6 = vmul.f32 %v756_v60, %v550_v3  ;;  %v675_v56 = vrot.slane %v642_v13, %v1504_v20 }
 0x336   : > { %622 = vrot.lane.b32.xlu1 %v550_v3, %s1294_s26  ;;  %620 = vrot.lane.b32.xlu0 %v1564_v63, %s1294_s26 }
 0x33a   : > { %667 = vrot.lane.b32.xlu1 %v550_v3, %s1295_s8  ;;  %665 = vrot.lane.b32.xlu0 %v1564_v63, %s1295_s8 }
 0x33e   : > { %712 = vrot.lane.b32.xlu1 %v550_v3, %s1296_s10  ;;  %710 = vrot.lane.b32.xlu0 %v1564_v63, %s1296_s10 }
 0x342   : > { %789 = vrot.lane.b32.xlu1 %v550_v3, %s1297_s11  ;;  %787 = vrot.lane.b32.xlu0 %v1564_v63, %s1297_s11 }
 0x346   : > { %834 = vrot.lane.b32.xlu1 %v550_v3, %s1298_s12  ;;  %832 = vrot.lane.b32.xlu0 %v1564_v63, %s1298_s12 }
 0x34a   : > { %555 = vrot.lane.b32.xlu1 %v532_v62, %s1293_s22  ;;  %553 = vrot.lane.b32.xlu0 %v1578_v16, %s1293_s22 }
 0x34e   : > { %600 = vrot.lane.b32.xlu1 %v532_v62, %s1294_s26  ;;  %598 = vrot.lane.b32.xlu0 %v1578_v16, %s1294_s26 }
 0x352   : > { %645 = vrot.lane.b32.xlu1 %v532_v62, %s1295_s8  ;;  %643 = vrot.lane.b32.xlu0 %v1578_v16, %s1295_s8 }
 0x356   : > { %690 = vrot.lane.b32.xlu1 %v532_v62, %s1296_s10  ;;  %688 = vrot.lane.b32.xlu0 %v1578_v16, %s1296_s10  ;;  %s1219_s10 = scalar_lea.vmem %s1786_s20, 1024 }
 0x357   : > { %p1220_p6 = scmp.ne.s32.totalorder %s1786_s20, %s1219_s10 }
 0x359   : > { %p1221_p12 = pnand %p1220_p6, %p1842_p11 }
 0x35a   : > { %879 = vrot.lane.b32.xlu1 %v550_v3, %s1299_s23  ;;  %877 = vrot.lane.b32.xlu0 %v1564_v63, %s1299_s23 }
 0x35b   : > { %p1222_p13 = pneg %p1221_p12 }
 0x35e   : > { %767 = vrot.lane.b32.xlu1 %v532_v62, %s1297_s11  ;;  %765 = vrot.lane.b32.xlu0 %v1578_v16, %s1297_s11  ;;  %s1301_s11 = smov [#allocation5]  }
 0x362   : > { %812 = vrot.lane.b32.xlu1 %v532_v62, %s1298_s12  ;;  %810 = vrot.lane.b32.xlu0 %v1578_v16, %s1298_s12  ;;  %s1223_s12 = sshll.u32 %s1301_s11, 4  ;;  %s1224_s12 = int_to_ptr.vmem [resolvable:$false] %s1223_s12 }
 0x363   : > { %p1226_p8 = scmp.lt.s32.totalorder %s1786_s20, %s1224_s12 }
 0x366   : > { %857 = vrot.lane.b32.xlu1 %v532_v62, %s1299_s23  ;;  %855 = vrot.lane.b32.xlu0 %v1578_v16, %s1299_s23  ;;  %s1225_s23 = scalar_lea.vmem %s1224_s12, 2048 }
 0x367   : > { %p1227_p10 = scmp.lt.s32.totalorder %s1225_s23, %s1219_s10 }
 0x369   : > { %p1228_p0 = por %p1227_p10, %p1226_p8 }
 0x36a   : > { %902 = vrot.lane.b32.xlu1 %v532_v62, %s1300_s25  ;;  %900 = vrot.lane.b32.xlu0 %v1578_v16, %s1300_s25  ;;  %v658_v62 = vrot.slane %v641_v48, %v1546_v46 }
 0x36b   : > { %p1229_p2 = pnand %p1228_p0, %p1222_p13 }
 0x36e   : > { %924 = vrot.lane.b32.xlu1 %v550_v3, %s1300_s25  ;;  %922 = vrot.lane.b32.xlu0 %v1564_v63, %s1300_s25  ;;  %v686_v3 = vld [vmem:[%s1834_s3 + $0x6] sm:$0x3] }
 0x3a4   : > { %v578_v17 = vpop.permute.xlu1 %577  ;;  %v576_v18 = vpop.permute.xlu0 %575 }
 0x3a5   : > { %v579_v43 = vsel %vm557_vm8, %v576_v18, %v578_v17  ;;  %v580_v44 = vsel %vm557_vm8, %v578_v17, %v576_v18 }
 0x3a6   : > { %v592_v57 = vmul.f32 %v585_v12, %v580_v44  ;;  %v593_v58 = vmul.f32 %v589_v39, %v579_v43 }
 0x3a8   : > { %v623_v19 = vpop.permute.xlu1 %622  ;;  %v621_v21 = vpop.permute.xlu0 %620 }
 0x3a9   : > { %v624_v7 = vsel %vm602_vm9, %v621_v21, %v623_v19  ;;  %v625_v10 = vsel %vm602_vm9, %v623_v19, %v621_v21  ;;  %v687_v21 = vld [vmem:[%s1834_s3 + $0x18] sm:$0x3] }
 0x3aa   : > { %v637_v38 = vmul.f32 %v630_v29, %v625_v10  ;;  %v638_v19 = vmul.f32 %v634_v55, %v624_v7 }
 0x3ac   : > { %v668_v22 = vpop.permute.xlu1 %667  ;;  %v666_v23 = vpop.permute.xlu0 %665 }
 0x3ad   : > { %v670_v13 = vsel %vm647_vm10, %v668_v22, %v666_v23 }
 0x3b0   : > { %v1592_v24 = vpop.permute.xlu1 %712  ;;  %v1594_v28 = vpop.permute.xlu0 %710 }
 0x3b4   : > { %v1596_v32 = vpop.permute.xlu1 %789  ;;  %v1598_v34 = vpop.permute.xlu0 %787 }
 0x3b8   : > { %v1603_v8 = vpop.permute.xlu1 %834  ;;  %v1605_v36 = vpop.permute.xlu0 %832 }
 0x3bc   : > { %v556_v41 = vpop.permute.xlu1 %555  ;;  %v554_v42 = vpop.permute.xlu0 %553 }
 0x3bd   : > { %v558_v45 = vsel %vm557_vm8, %v554_v42, %v556_v41  ;;  %v559_v47 = vsel %vm557_vm8, %v556_v41, %v554_v42  ;;  %v669_v42 = vsel %vm647_vm10, %v666_v23, %v668_v22  ;;  %v752_v22 = vrot.slane %v1557_v52, %v1504_v20 }
 0x3be   : > { %v571_v49 = vmul.f32 %v564_v2, %v559_v47  ;;  %v572_v50 = vmul.f32 %v568_v37, %v558_v45  ;;  %v699_v2 = vrot.slane %v686_v3, %v1504_v20  ;;  %v703_v37 = vrot.slane %v686_v3, %v1546_v46 }
 0x3bf   : > { %v682_v23 = vmul.f32 %v675_v56, %v670_v13  ;;  %v683_v29 = vmul.f32 %v679_v0, %v669_v42  ;;  %v764_v56 = vld [vmem:[%s1834_s3 + $0x1c] sm:$0x3] }
 0x3c0   : > { %v601_v59 = vpop.permute.xlu1 %600  ;;  %v599_v60 = vpop.permute.xlu0 %598  ;;  %v594_v15 = vadd.f32 %v592_v57, %v571_v49  ;;  %v595_v17 = vadd.f32 %v593_v58, %v572_v50  ;;  %v720_v50 = vrot.slane %v687_v21, %v1504_v20  ;;  %v797_v0 = vrot.slane %v764_v56, %v1504_v20 }
 0x3c1   : > { %v603_v11 = vsel %vm602_vm9, %v599_v60, %v601_v59  ;;  %v604_v14 = vsel %vm602_vm9, %v601_v59, %v599_v60  ;;  %v714_v60 = vsel %vm692_vm11, %v1594_v28, %v1592_v24 }
 0x3c2   : > { %v616_v18 = vmul.f32 %v609_v53, %v604_v14  ;;  %v617_v1 = vmul.f32 %v613_v54, %v603_v11  ;;  %v724_v53 = vrot.slane %v687_v21, %v1546_v46  ;;  %v737_v54 = vrot.slane %v1552_v51, %v1504_v20  ;;  %v763_v11 = vld [vmem:[%s1834_s3 + $0xa] sm:$0x3] }
 0x3c4   : > { %v618_v12 = vadd.f32 %v616_v18, %v594_v15  ;;  %v619_v39 = vadd.f32 %v617_v1, %v595_v17  ;;  %v646_v40 = vpop.permute.xlu1 %645  ;;  %v644_v41 = vpop.permute.xlu0 %643 }
 0x3c5   : > { %v648_v43 = vsel %vm647_vm10, %v644_v41, %v646_v40  ;;  %v649_v44 = vsel %vm647_vm10, %v646_v40, %v644_v41  ;;  %v801_v40 = vrot.slane %v764_v56, %v1546_v46  ;;  %v837_v56 = vsel %vm814_vm13, %v1603_v8, %v1605_v36 }
 0x3c6   : > { %v639_v45 = vadd.f32 %v637_v38, %v618_v12  ;;  %v640_v47 = vadd.f32 %v638_v19, %v619_v39  ;;  %v661_v48 = vmul.f32 %v654_v61, %v649_v44  ;;  %v662_v49 = vmul.f32 %v658_v62, %v648_v43  ;;  %v808_v38 = vld [vmem:[%s1834_s3 + $0xc] sm:$0x3] }
 0x3c7   : > { %v715_v61 = vsel %vm692_vm11, %v1592_v24, %v1594_v28  ;;  %v728_v24 = vmul.f32 %v724_v53, %v714_v60  ;;  %v809_v28 = vld [vmem:[%s1834_s3 + $0x1e] sm:$0x3]  ;;  %v776_v12 = vrot.slane %v763_v11, %v1504_v20  ;;  %v780_v39 = vrot.slane %v763_v11, %v1546_v46 }
 0x3c8   : > { %v663_v55 = vadd.f32 %v661_v48, %v639_v45  ;;  %v664_v57 = vadd.f32 %v662_v49, %v640_v47  ;;  %v691_v58 = vpop.permute.xlu1 %690  ;;  %v689_v59 = vpop.permute.xlu0 %688  ;;  %v727_v14 = vmul.f32 %v720_v50, %v715_v61  ;;  %v842_v41 = vrot.slane %v809_v28, %v1504_v20  ;;  %v853_v48 = vld [vmem:[%s1834_s3 + $0xe] sm:$0x3] }
 0x3c9   : > { %v693_v51 = vsel %vm692_vm11, %v689_v59, %v691_v58  ;;  %v694_v52 = vsel %vm692_vm11, %v691_v58, %v689_v59  ;;  %v821_v45 = vrot.slane %v808_v38, %v1504_v20  ;;  %v825_v47 = vrot.slane %v808_v38, %v1546_v46 }
 0x3ca   : > { %v684_v62 = vadd.f32 %v682_v23, %v663_v55  ;;  %v685_v3 = vadd.f32 %v683_v29, %v664_v57  ;;  %v706_v7 = vmul.f32 %v699_v2, %v694_v52  ;;  %v707_v10 = vmul.f32 %v703_v37, %v693_v51 }
 0x3cb   : > { %v759_v2 = vmul.f32 %v752_v22, %v1564_v63  ;;  %v744_v37 = vmul.f32 %v737_v54, %v1578_v16  ;;  %v846_v63 = vrot.slane %v809_v28, %v1546_v46  ;;  %v854_v16 = vld [vmem:[%s1834_s3 + $0x20] sm:$0x3]  ;;  %v791_v49 = vsel %vm769_vm12, %v1598_v34, %v1596_v32 }
 0x3cc   : > { %v708_v15 = vadd.f32 %v706_v7, %v684_v62  ;;  %v709_v17 = vadd.f32 %v707_v10, %v685_v3  ;;  %v880_v18 = vpop.permute.xlu1 %879  ;;  %v878_v1 = vpop.permute.xlu0 %877  ;;  %v887_v55 = vrot.slane %v854_v16, %v1504_v20  ;;  %v866_v57 = vrot.slane %v853_v48, %v1504_v20 }
 0x3cd   : > { %v870_v58 = vrot.slane %v853_v48, %v1546_v46  ;;  %v836_v52 = vsel %vm814_vm13, %v1605_v36, %v1603_v8  ;;  %v850_v8 = vmul.f32 %v846_v63, %v837_v56  ;;  %v881_v38 = vsel %vm859_vm14, %v878_v1, %v880_v18 }
 0x3ce   : > { %v729_v19 = vadd.f32 %v727_v14, %v708_v15  ;;  %v730_v21 = vadd.f32 %v728_v24, %v709_v17  ;;  %v891_v24 = vrot.slane %v854_v16, %v1546_v46  ;;  %v849_v17 = vmul.f32 %v842_v41, %v836_v52  ;;  %v899_v16 = vld [vmem:[%s1834_s3 + $0x22] sm:$0x3] }
 0x3cf   : > { %v932_v48 = vrot.slane %v899_v16, %v1504_v20 }
 0x3d0   : > { %v768_v42 = vpop.permute.xlu1 %767  ;;  %v747_v13 = vadd.f32 %v1567_v4, %v730_v21  ;;  %v766_v43 = vpop.permute.xlu0 %765  ;;  %v746_v44 = vadd.f32 %v744_v37, %v729_v19  ;;  %v792_v4 = vsel %vm769_vm12, %v1596_v32, %v1598_v34  ;;  %v804_v32 = vmul.f32 %v797_v0, %v791_v49 }
 0x3d1   : > { %v770_v50 = vsel %vm769_vm12, %v766_v43, %v768_v42  ;;  %v771_v53 = vsel %vm769_vm12, %v768_v42, %v766_v43  ;;  %v805_v34 = vmul.f32 %v801_v40, %v792_v4  ;;  %v882_v19 = vsel %vm859_vm14, %v880_v18, %v878_v1 }
 0x3d2   : > { %v762_v54 = vadd.f32 %v1569_v6, %v747_v13  ;;  %v761_v22 = vadd.f32 %v759_v2, %v746_v44  ;;  %v783_v23 = vmul.f32 %v776_v12, %v770_v50  ;;  %v784_v29 = vmul.f32 %v780_v39, %v771_v53  ;;  %v898_v6 = vld [vmem:[%s1834_s3 + $0x10] sm:$0x3] }
 0x3d3   : > { %v911_v28 = vrot.slane %v898_v6, %v1504_v20  ;;  %v915_v15 = vrot.slane %v898_v6, %v1546_v46  ;;  %v894_v42 = vmul.f32 %v887_v55, %v881_v38  ;;  %v895_v13 = vmul.f32 %v891_v24, %v882_v19 }
 0x3d4   : > { %v785_v59 = vadd.f32 %v783_v23, %v761_v22  ;;  %v786_v60 = vadd.f32 %v784_v29, %v762_v54  ;;  %v813_v61 = vpop.permute.xlu1 %812  ;;  %v811_v51 = vpop.permute.xlu0 %810  ;;  %v936_v49 = vrot.slane %v899_v16, %v1546_v46 }
 0x3d5   : > { %v815_v62 = vsel %vm814_vm13, %v811_v51, %v813_v61  ;;  %v816_v3 = vsel %vm814_vm13, %v813_v61, %v811_v51 }
 0x3d6   : > { %v807_v7 = vadd.f32 %v805_v34, %v786_v60  ;;  %v806_v10 = vadd.f32 %v804_v32, %v785_v59  ;;  %v828_v11 = vmul.f32 %v821_v45, %v815_v62  ;;  %v829_v14 = vmul.f32 %v825_v47, %v816_v3 }
 0x3d8   : > { %v830_v36 = vadd.f32 %v828_v11, %v806_v10  ;;  %v831_v0 = vadd.f32 %v829_v14, %v807_v7  ;;  %v858_v2 = vpop.permute.xlu1 %857  ;;  %v856_v37 = vpop.permute.xlu0 %855 }
 0x3d9   : > { %v860_v21 = vsel %vm859_vm14, %v856_v37, %v858_v2  ;;  %v861_v12 = vsel %vm859_vm14, %v858_v2, %v856_v37 }
 0x3da   : > { %v852_v39 = vadd.f32 %v850_v8, %v831_v0  ;;  %v851_v40 = vadd.f32 %v849_v17, %v830_v36  ;;  %v873_v41 = vmul.f32 %v866_v57, %v860_v21  ;;  %v874_v63 = vmul.f32 %v870_v58, %v861_v12 }
 0x3dc   : > { %v875_v43 = vadd.f32 %v873_v41, %v851_v40  ;;  %v876_v44 = vadd.f32 %v874_v63, %v852_v39  ;;  %v903_v45 = vpop.permute.xlu1 %902  ;;  %v901_v18 = vpop.permute.xlu0 %900 }
 0x3dd   : > { %v905_v1 = vsel %vm904_vm15, %v901_v18, %v903_v45  ;;  %v906_v47 = vsel %vm904_vm15, %v903_v45, %v901_v18 }
 0x3de   : > { %v897_v4 = vadd.f32 %v895_v13, %v876_v44  ;;  %v896_v50 = vadd.f32 %v894_v42, %v875_v43  ;;  %v918_v53 = vmul.f32 %v911_v28, %v905_v1  ;;  %v919_v54 = vmul.f32 %v915_v15, %v906_v47 }
 0x3e0   : > { %v921_v22 = vadd.f32 %v919_v54, %v897_v4  ;;  %v925_v23 = vpop.permute.xlu1 %924  ;;  %v923_v29 = vpop.permute.xlu0 %922  ;;  %v920_v58 = vadd.f32 %v918_v53, %v896_v50 }
 0x3e1   : > { %v926_v55 = vsel %vm904_vm15, %v923_v29, %v925_v23  ;;  %v927_v57 = vsel %vm904_vm15, %v925_v23, %v923_v29 }
 0x3e2   : > { %v939_v32 = vmul.f32 %v932_v48, %v926_v55  ;;  %v940_v34 = vmul.f32 %v936_v49, %v927_v57 }
 0x3e4   : > { %v941_v59 = vadd.f32 %v939_v32, %v920_v58  ;;  %v942_v46 = vadd.f32 %v940_v34, %v921_v22 }
 0x3e6   : > { %v1079_v60 = vmul.f32 -1.442695, %v941_v59  ;;  %v1080_v61 = vmul.f32 -1.442695, %v942_v46 }
 0x3e8   : > { %1181 = vpow2.f32 %v1079_v60 }
 0x3e9   : > { %1183 = vpow2.f32 %v1080_v61 }
 0x3f2   : > { %v1182_v51 = vpop.eup %1181 }
 0x3f3   : > { %v1184_v6 = vpop.eup %1183  ;;  %v949_v52 = vadd.f32 1.0, %v1182_v51 }
 0x3f4   : > { %v950_v56 = vadd.f32 1.0, %v1184_v6 }
 0x3f5   : > { %1185 = vrcp.f32 %v949_v52 }
 0x3f6   : > { %1187 = vrcp.f32 %v950_v56 }
 0x3ff   : > { %v1186_v62 = vpop.eup %1185 }
 0x400   : > { %v1188_v27 = vpop.eup %1187  ;;  %v958_v3 = vrot.slane %v1186_v62, %v1504_v20 }
 0x401   : > { %v962_v7 = vrot.slane %v1188_v27, %v1504_v20 }
 0x402   : > { %v963_v10 = vmul.f32 %v958_v3, %v1522_v33  ;;  %v965_v11 = vmul.f32 %v958_v3, %v1525_v5  ;;  %v967_v14 = vmul.f32 %v958_v3, %v1517_v31  ;;  %v969_v24 = vmul.f32 %v958_v3, %v1529_v35 }
 0x403   : > { %v964_v28 = vmul.f32 %v962_v7, %v1511_v26  ;;  %v966_v15 = vmul.f32 %v962_v7, %v1508_v25  ;;  %v968_v20 = vmul.f32 %v962_v7, %v1514_v30  ;;  %v970_v33 = vmul.f32 %v962_v7, %v1532_v9 }
 0x404   : > { %971 = vst [vmem:[%s215_s9] sm:$0xff] %v963_v10  ;;  %973 = vst [vmem:[%s215_s9 + $0x10] sm:$0xff] %v965_v11 }
 0x405   : > { %975 = vst [vmem:[%s215_s9 + $0x20] sm:$0xff] %v967_v14  ;;  %977 = vst [vmem:[%s215_s9 + $0x30] sm:$0xff] %v969_v24 }
 0x406   : > { %972 = vst [vmem:[%s215_s9 + $0x8] sm:$0xff] %v964_v28  ;;  %974 = vst [vmem:[%s215_s9 + $0x18] sm:$0xff] %v966_v15 }
 0x407   : > { %976 = vst [vmem:[%s215_s9 + $0x28] sm:$0xff] %v968_v20  ;;  %978 = vst [vmem:[%s215_s9 + $0x38] sm:$0xff] %v970_v33 }
 0x408   : > { %1232 = shalt.err (!%p1229_p2)
}
 0x409   : > { %s1233_s25 = scalar_lea.hbm %s1780_s19, 1024  ;;  %s1237_s5 = scalar_lea.hbm %s1835_s4, 2048 }
 0x40a   : > { %p1234_p4 = scmp.ne.s32.totalorder %s1780_s19, %s1233_s25  ;;  %p1238_p9 = scmp.lt.u32.totalorder %s1780_s19, %s1835_s4 }
 0x40b   : > { %p1239_p1 = scmp.lt.u32.totalorder %s1237_s5, %s1233_s25  ;;  %p1241_p6 = scmp.lt.u32.totalorder %s1233_s25, %s1780_s19 }
 0x40c   : > { %p1235_p5 = pnand %p1234_p4, %p1842_p11 }
 0x40d   : > { %p1240_p3 = por %p1239_p1, %p1238_p9 }
 0x40e   : > { %p1236_p7 = pneg %p1235_p5 }
 0x40f   : > { %p1242_p12 = por %p1241_p6, %p1240_p3 }
 0x411   : > { %p1243_p13 = pnand %p1242_p12, %p1236_p7 }
 0x413   : > { %1246 = shalt.err (!%p1243_p13)
}
 0x414   : > { %s1302_s9 = smov 256  }
 0x415   : > { %1119 = dma.vmem_to_hbm [thread:$0]  (%p1842_p11), %s1786_s20, 1024, %s1780_s19, %s980_s14, %s1302_s9, %s1302_s9, %s1294_s26  }
 0x416 PF: > { %s1008_s22 = sand.u32 1, %s1273_s15   ;;  %p1843_p8 = scmp.ne.s32.totalorder %s1840_s28, 0 }
 0x417   : > { %p1844_p10 = scmp.ge.s32.totalorder %s1285_s18, 2  ;;  %s1009_s8 = scalar_lea.sflag [#allocation4], %s1008_s22 }
 0x419   : > { %p1126_p0 = pnand %p1844_p10, %p1843_p8 }
 0x41b   : > { %1268 = dma.done.wait (!%p1126_p0), %s1009_s8, 1024  }
 0x41c   : > { %1270 = vsyncadd (!%p1126_p0), %s1009_s8, 4294966272  ;;  %p17_p2 = scmp.ge.s32.totalorder %s1353_s21, 4   ;;  %s1845_s15 = smov %s1277_s16 }
 0x41d   : > { %s1846_s16 = smov %s1281_s17  ;;  %s1847_s17 = smov %s1365_s24 }
 0x41e   : > { %s1848_s18 = smov %s1353_s21  ;;  %19 = sbr.rel (!%p17_p2) target bundleno = 5 (0x5), region = 81 }
 0x425   :  { %1014 = vsyncpa [#allocation3], 1 }
 0x426   :  { %1016 = vsyncpa [#allocation3 + $0x1], 1 }
 0x427   :  { %1017 = vsyncpa [#allocation4], 1 }
 0x428   :  { %1019 = vsyncpa [#allocation4 + $0x1], 1 }

</bundles_post_ra>
